<compile_context>
chip_gen: v7x
topology: tpu7x:2x2x1
jax: 0.10.0
libtpu: 0.0.40
codegen_flags: <defaults>
</compile_context>

<pallas_src>
import functools

import jax
import jax.numpy as jnp
from jax import lax
from jax.experimental import pallas as pl
from jax.experimental.pallas import tpu as pltpu


def _pick_tile(dim, pref, quantum):
    """Largest tile <= pref that divides dim and is a multiple of `quantum`,
    falling back to the full dim (always a legal block shape)."""
    if dim <= pref:
        return dim
    t = (pref // quantum) * quantum
    while t >= quantum:
        if dim % t == 0:
            return t
        t -= quantum
    return dim  # TODO(synk): pad N host-side to a multiple of 256 for huge graphs


def _default_exp_dtype():
    # bf16 EUP exists on v6e / v7x; keep f32 exp on v5e and older generations.
    try:
        kind = jax.devices()[0].device_kind.lower()
    except Exception:
        return jnp.float32
    return jnp.bfloat16 if ("v6" in kind or "v7" in kind) else jnp.float32


# ----------------------------------------------------------------------------
# Tiled matmul (GATConv's bias-free linear transform), bf16 MXU / f32 accumulate
# ----------------------------------------------------------------------------

def _matmul_kernel(x_ref, w_ref, o_ref, acc_ref):
    @pl.when(pl.program_id(2) == 0)
    def _():
        acc_ref[...] = jnp.zeros_like(acc_ref)

    acc_ref[...] += jnp.dot(x_ref[...], w_ref[...],
                            preferred_element_type=jnp.float32)

    @pl.when(pl.program_id(2) == pl.num_programs(2) - 1)
    def _():
        o_ref[...] = acc_ref[...].astype(o_ref.dtype)


def matmul(x, w, *, tm=256, tn=256, tk=512, out_dtype=jnp.bfloat16):
    M, K = x.shape
    K2, N = w.shape
    assert K == K2
    tm = _pick_tile(M, tm, 8)
    tn = _pick_tile(N, tn, 128)
    tk = _pick_tile(K, tk, 128)
    return pl.pallas_call(
        _matmul_kernel,
        out_shape=jax.ShapeDtypeStruct((M, N), out_dtype),
        grid_spec=pltpu.PrefetchScalarGridSpec(
            num_scalar_prefetch=0,
            grid=(M // tm, N // tn, K // tk),
            in_specs=[pl.BlockSpec((tm, tk), lambda i, j, k: (i, k)),
                      pl.BlockSpec((tk, tn), lambda i, j, k: (k, j))],
            out_specs=pl.BlockSpec((tm, tn), lambda i, j, k: (i, j)),
            scratch_shapes=[pltpu.VMEM((tm, tn), jnp.float32)]),
        compiler_params=pltpu.CompilerParams(
            dimension_semantics=("parallel", "parallel", "arbitrary")),
    )(x, w)


# ----------------------------------------------------------------------------
# Per-layer attention projections: e_dst[n, g] = sum_f h[n, g, f] * a_dst[g, f]
# (and likewise e_src).  Done once per layer so the attention inner loop never
# redoes the cross-lane reductions.
# ----------------------------------------------------------------------------

def _attn_proj_kernel(hw_ref, asrc_ref, adst_ref, edst_ref, esrc_ref,
                      *, heads, f_head):
    hw = hw_ref[...].astype(jnp.float32)            # (tm, heads*f_head)
    a_src = asrc_ref[...]                           # (1, heads*f_head) f32
    a_dst = adst_ref[...]
    tm = hw.shape[0]
    lane = lax.broadcasted_iota(jnp.int32, (tm, heads), 1)
    e_dst = jnp.zeros((tm, heads), jnp.float32)
    e_src = jnp.zeros((tm, heads), jnp.float32)
    for g in range(heads):                           # heads unrolled (small)
        sl = slice(g * f_head, (g + 1) * f_head)
        ed = jnp.sum(hw[:, sl] * a_dst[:, sl], axis=-1, keepdims=True)   # (tm, 1)
        es = jnp.sum(hw[:, sl] * a_src[:, sl], axis=-1, keepdims=True)
        e_dst = jnp.where(lane == g, ed, e_dst)
        e_src = jnp.where(lane == g, es, e_src)
    edst_ref[...] = e_dst
    esrc_ref[...] = e_src


def attn_projections(hw, a_src, a_dst, *, heads, f_head, tm=512):
    N, hf = hw.shape
    assert hf == heads * f_head
    tm = _pick_tile(N, tm, 8)
    kernel = functools.partial(_attn_proj_kernel, heads=heads, f_head=f_head)
    e_dst, e_src = pl.pallas_call(
        kernel,
        out_shape=(jax.ShapeDtypeStruct((N, heads), jnp.float32),
                   jax.ShapeDtypeStruct((N, heads), jnp.float32)),
        grid_spec=pltpu.PrefetchScalarGridSpec(
            num_scalar_prefetch=0,
            grid=(N // tm,),
            in_specs=[pl.BlockSpec((tm, hf), lambda i: (i, 0)),
                      pl.BlockSpec((1, hf), lambda i: (0, 0)),
                      pl.BlockSpec((1, hf), lambda i: (0, 0))],
            out_specs=[pl.BlockSpec((tm, heads), lambda i: (i, 0)),
                       pl.BlockSpec((tm, heads), lambda i: (i, 0))]),
        compiler_params=pltpu.CompilerParams(
            dimension_semantics=("parallel",)),
    )(hw, a_src, a_dst)
    return e_dst, e_src


# ----------------------------------------------------------------------------
# Flash-style multi-head GAT attention with block-sparse tile skipping.
# All heads fused; bias + ELU (+ mean over heads for concat=False) in epilogue.
# ----------------------------------------------------------------------------

def _gat_attn_kernel(nz_ref, edst_ref, esrc_ref, hk_ref, mask_ref, bias_ref,
                     o_ref, m_sc, l_sc, acc_sc,
                     *, heads, f_head, concat, act, out_dim, exp_dtype):
    qi = pl.program_id(0)
    kv = pl.program_id(1)

    @pl.when(kv == 0)
    def _():
        m_sc[...] = jnp.full_like(m_sc, -1e30)
        l_sc[...] = jnp.zeros_like(l_sc)
        acc_sc[...] = jnp.zeros_like(acc_sc)

    # Block-sparse skip: the O(tq*tk) work runs only if this tile has any edge.
    @pl.when(nz_ref[qi, kv] != 0)
    def _():
        mask = mask_ref[...] != 0                    # (tq, tk) bool, head-invariant
        e_dst = edst_ref[...]                        # (tq, heads) f32
        e_src = esrc_ref[...]                        # (heads, tk) f32
        hk = hk_ref[...]                             # (tk, heads*f_head) bf16
        m_prev = m_sc[...]                           # (tq, heads)
        l_prev = l_sc[...]
        tq = m_prev.shape[0]
        head_lane = lax.broadcasted_iota(jnp.int32, (tq, heads), 1)
        m_full = m_prev
        l_full = l_prev
        for g in range(heads):                        # heads unrolled (small)
            sl = slice(g * f_head, (g + 1) * f_head)
            logits = e_dst[:, g:g + 1] + e_src[g:g + 1, :]          # (tq, tk)
            # LeakyReLU, negative_slope = 0.2 (PyG GATConv default), then mask.
            logits = jnp.where(logits > 0, logits, 0.2 * logits)
            logits = jnp.where(mask, logits, jnp.float32(-1e30))
            m_p = m_prev[:, g:g + 1]
            m_n = jnp.maximum(m_p, jnp.max(logits, axis=-1, keepdims=True))
            r = jnp.exp(m_p - m_n)
            p = jnp.exp((logits - m_n).astype(exp_dtype))   # bf16 EUP on v6e/v7x
            p = jnp.where(mask, p, jnp.zeros_like(p))
            l_n = r * l_prev[:, g:g + 1] + jnp.sum(
                p.astype(jnp.float32), axis=-1, keepdims=True)
            pv = jnp.dot(p.astype(jnp.bfloat16), hk[:, sl],
                         preferred_element_type=jnp.float32)
            # acc slices are lane-aligned at f_head granularity; keep slab stores.
            acc_sc[:, sl] = r * acc_sc[:, sl] + pv
            m_full = jnp.where(head_lane == g, m_n, m_full)
            l_full = jnp.where(head_lane == g, l_n, l_full)
        # One full-width store each for the running max / denominator.
        m_sc[...] = m_full
        l_sc[...] = l_full

    @pl.when(kv == pl.num_programs(1) - 1)
    def _():
        bias = bias_ref[...]                                  # (1, out_dim)
        # Self-loops guarantee every row has an edge; guard anyway.
        l = jnp.maximum(l_sc[...], 1e-30)
        acc = acc_sc[...]
        tq, hf = acc.shape
        if concat:
            lane_head = lax.broadcasted_iota(jnp.int32, (tq, hf), 1) // f_head
            inv_full = jnp.zeros((tq, hf), jnp.float32)
            for g in range(heads):
                inv_full = jnp.where(lane_head == g,
                                     pl.reciprocal(l[:, g:g + 1], approx=True),
                                     inv_full)
            y = acc * inv_full + bias
        else:
            y = jnp.zeros((tq, f_head), jnp.float32)
            for g in range(heads):
                sl = slice(g * f_head, (g + 1) * f_head)
                y = y + acc[:, sl] * pl.reciprocal(l[:, g:g + 1], approx=True)
            y = y * (1.0 / heads) + bias
        if act == "elu":
            y = jnp.where(y > 0, y, jnp.expm1(jnp.minimum(y, 0.0)))
        pad = o_ref.shape[-1] - out_dim
        if pad > 0:      # lane-dense (128-multiple) output slab; wrapper slices it
            y = jnp.concatenate(
                [y, jnp.zeros((y.shape[0], pad), y.dtype)], axis=-1)
        o_ref[...] = y.astype(o_ref.dtype)


def gat_attention(h, e_dst, e_src_t, mask, tile_nz, bias, *, heads, f_head,
                  concat, act, out_dtype, tq, tk, exp_dtype):
    # h: (N, heads*f_head) bf16 (lane-dense, head-major columns)
    N, hf = h.shape
    assert hf == heads * f_head
    assert N % tq == 0 and N % tk == 0
    nq, nk = N // tq, N // tk
    assert tile_nz.shape == (nq, nk)
    out_dim = hf if concat else f_head
    out_pad = out_dim if out_dim % 128 == 0 else ((out_dim + 127) // 128) * 128
    kernel = functools.partial(
        _gat_attn_kernel, heads=heads, f_head=f_head, concat=concat, act=act,
        out_dim=out_dim, exp_dtype=exp_dtype)
    out = pl.pallas_call(
        kernel,
        out_shape=jax.ShapeDtypeStruct((N, out_pad), out_dtype),
        grid_spec=pltpu.PrefetchScalarGridSpec(
            num_scalar_prefetch=1,                    # tile_nz -> SMEM
            grid=(nq, nk),
            in_specs=[
                pl.BlockSpec((tq, heads), lambda qi, ki, nz: (qi, 0)),   # e_dst
                pl.BlockSpec((heads, tk), lambda qi, ki, nz: (0, ki)),   # e_src^T
                pl.BlockSpec((tk, hf), lambda qi, ki, nz: (ki, 0)),      # h (source)
                pl.BlockSpec((tq, tk), lambda qi, ki, nz: (qi, ki)),     # int8 mask
                pl.BlockSpec((1, out_dim), lambda qi, ki, nz: (0, 0)),   # bias
            ],
            out_specs=pl.BlockSpec((tq, out_pad), lambda qi, ki, nz: (qi, 0)),
            scratch_shapes=[
                pltpu.VMEM((tq, heads), jnp.float32),   # running max, per head
                pltpu.VMEM((tq, heads), jnp.float32),   # running denom, per head
                pltpu.VMEM((tq, hf), jnp.float32),      # running weighted sum
            ]),
        compiler_params=pltpu.CompilerParams(
            dimension_semantics=("parallel", "arbitrary")),
    )(tile_nz, e_dst, e_src_t, h, mask, bias)
    return out if out_pad == out_dim else out[:, :out_dim]


# ----------------------------------------------------------------------------
# Fully fused decoder: (Linear + eval-mode BN folded) x L, ELU between layers.
# Grid over row tiles; all (small) weights resident in VMEM across the grid.
# ----------------------------------------------------------------------------

def _decoder_kernel(x_ref, *refs, acts):
    o_ref = refs[-1]
    wb = refs[:-1]
    y = x_ref[...].astype(jnp.float32)
    for i, act in enumerate(acts):
        w_ref = wb[2 * i]
        b_ref = wb[2 * i + 1]
        y = jnp.dot(y.astype(jnp.bfloat16), w_ref[...],
                    preferred_element_type=jnp.float32) + b_ref[...]
        if act == "elu":
            y = jnp.where(y > 0, y, jnp.expm1(jnp.minimum(y, 0.0)))
    o_ref[...] = y.astype(o_ref.dtype)


def fused_decoder(z, weights, biases, acts, *, tm=256):
    # TODO(synk): for very large gene counts (input_dim ~20k) on v7x, add an
    #             output-column grid axis for the final layer to bound VMEM.
    N, in_dim = z.shape
    tm = _pick_tile(N, tm, 8)
    out_dim = weights[-1].shape[1]
    in_specs = [pl.BlockSpec((tm, in_dim), lambda i: (i, 0))]
    args = [z]
    for W, b in zip(weights, biases):
        in_specs.append(pl.BlockSpec(W.shape, lambda i: (0, 0)))
        in_specs.append(pl.BlockSpec(b.shape, lambda i: (0, 0)))
        args.extend([W, b])
    return pl.pallas_call(
        functools.partial(_decoder_kernel, acts=tuple(acts)),
        out_shape=jax.ShapeDtypeStruct((N, out_dim), jnp.float32),
        grid_spec=pltpu.PrefetchScalarGridSpec(
            num_scalar_prefetch=0,
            grid=(N // tm,),
            in_specs=in_specs,
            out_specs=pl.BlockSpec((tm, out_dim), lambda i: (i, 0))),
        compiler_params=pltpu.CompilerParams(
            dimension_semantics=("parallel",)),
    )(*args)


# ----------------------------------------------------------------------------
# Parameters & forward pass
# ----------------------------------------------------------------------------

def init_scgac_params(key, input_dim, hidden_dims, latent_dim, heads=4):
    params = {"enc": [], "heads": heads}

    # ---- Encoder: GATConv stack (concat=True except last layer) ----
    enc_layers = [input_dim] + list(hidden_dims)
    gat_dims = []
    for i in range(len(enc_layers) - 1):
        gat_dims.append((enc_layers[i], enc_layers[i + 1] // heads, True))
    gat_dims.append((enc_layers[-1], latent_dim, False))

    for (in_dim, f_head, concat) in gat_dims:
        key, k1, k2, k3, k4 = jax.random.split(key, 5)
        W = 0.1 * jax.random.normal(k1, (in_dim, heads * f_head), jnp.float32)
        a_src = 0.1 * jax.random.normal(k2, (1, heads * f_head), jnp.float32)
        a_dst = 0.1 * jax.random.normal(k3, (1, heads * f_head), jnp.float32)
        out_dim = heads * f_head if concat else f_head
        b = 0.1 * jax.random.normal(k4, (1, out_dim), jnp.float32)
        params["enc"].append(dict(
            W=W.astype(jnp.bfloat16), a_src=a_src, a_dst=a_dst, b=b,
            concat=concat, heads=heads, f_head=f_head))

    # ---- Decoder: Linear + eval-mode BN folded into W/b (+ ELU) ----
    dec_layers = [latent_dim] + list(hidden_dims[::-1]) + [input_dim]
    eps = 1e-5
    dec_w, dec_b, dec_acts = [], [], []
    for i in range(len(dec_layers) - 1):
        key, k1, k2, k3, k4 = jax.random.split(key, 5)
        in_dim, out_dim = dec_layers[i], dec_layers[i + 1]
        W = 0.1 * jax.random.normal(k1, (in_dim, out_dim), jnp.float32)
        b = 0.1 * jax.random.normal(k2, (1, out_dim), jnp.float32)
        gamma = 1.0 + 0.1 * jax.random.normal(k3, (1, out_dim), jnp.float32)
        beta = 0.1 * jax.random.normal(k4, (1, out_dim), jnp.float32)
        # Eval-mode BN with running_mean=0, running_var=1 folded into Linear.
        scale = gamma / jnp.sqrt(1.0 + eps)
        dec_w.append((W * scale).astype(jnp.bfloat16))
        dec_b.append(b * scale + beta)
        dec_acts.append(None if i == len(dec_layers) - 2 else "elu")
    params["dec_w"], params["dec_b"], params["dec_acts"] = dec_w, dec_b, dec_acts
    return params


def _tile_nonzero(mask, tq, tk):
    nq, nk = mask.shape[0] // tq, mask.shape[1] // tk
    m = (mask != 0).reshape(nq, tq, nk, tk)
    return jnp.any(m, axis=(1, 3)).astype(jnp.int32)


def scgac_forward(params, x, mask, *, tq=256, tk=512, exp_dtype=None):
    if exp_dtype is None:
        exp_dtype = _default_exp_dtype()
    enc = params["enc"]
    N = x.shape[0]
    tq = _pick_tile(N, tq, 32)     # 32: int8 mask sublane tiling
    tk = _pick_tile(N, tk, 128)
    tile_nz = _tile_nonzero(mask, tq, tk)
    h = x.astype(jnp.bfloat16)
    z = None
    for li, layer in enumerate(enc):
        is_last = li == len(enc) - 1
        hw = matmul(h, layer["W"], out_dtype=jnp.bfloat16)   # (N, heads*F) lane-dense
        e_dst, e_src = attn_projections(hw, layer["a_src"], layer["a_dst"],
                                        heads=layer["heads"],
                                        f_head=layer["f_head"])
        out = gat_attention(
            hw, e_dst, jnp.transpose(e_src), mask, tile_nz, layer["b"],
            heads=layer["heads"], f_head=layer["f_head"], concat=layer["concat"],
            act=None if is_last else "elu",
            out_dtype=jnp.float32 if is_last else jnp.bfloat16,
            tq=tq, tk=tk, exp_dtype=exp_dtype)
        if is_last:
            z = out
        else:
            h = out
    x_recon = fused_decoder(z, params["dec_w"], params["dec_b"], params["dec_acts"])
    return x_recon, z


def build_dense_mask(edge_index, n_nodes):
    # mask[target, source] = 1 for each edge, plus self-loops (PyG default).
    src, tgt = edge_index[0], edge_index[1]
    mask = jnp.zeros((n_nodes, n_nodes), jnp.int8)
    mask = mask.at[tgt, src].set(1)
    idx = jnp.arange(n_nodes)
    mask = mask.at[idx, idx].set(1)
    return mask      # int8: narrow dtype for the only O(N^2) HBM stream


# ----------------------------------------------------------------------------
# Pure-JAX reference (mirrors the kernel's cast points) for correctness check
# ----------------------------------------------------------------------------

def ref_forward(params, x, mask, exp_dtype=jnp.float32):
    maskb = mask != 0
    h = x.astype(jnp.bfloat16)
    z = None
    enc = params["enc"]
    for li, layer in enumerate(enc):
        is_last = li == len(enc) - 1
        heads, f_head = layer["heads"], layer["f_head"]
        hw = jnp.dot(h, layer["W"], preferred_element_type=jnp.float32)
        hw_b = hw.astype(jnp.bfloat16)
        outs = []
        for g in range(heads):
            sl = slice(g * f_head, (g + 1) * f_head)
            hg = hw_b[:, sl].astype(jnp.float32)
            e_dst = jnp.sum(hg * layer["a_dst"][:, sl], axis=-1, keepdims=True)
            e_src = jnp.sum(hg * layer["a_src"][:, sl], axis=-1, keepdims=True)
            logits = e_dst + e_src.T
            logits = jnp.where(logits > 0, logits, 0.2 * logits)
            logits = jnp.where(maskb, logits, -1e30)
            m = jnp.max(logits, axis=-1, keepdims=True)
            p = jnp.exp((logits - m).astype(exp_dtype))
            p = jnp.where(maskb, p, jnp.zeros_like(p))
            l = jnp.sum(p.astype(jnp.float32), axis=-1, keepdims=True)
            agg = jnp.dot(p.astype(jnp.bfloat16), hw_b[:, sl],
                          preferred_element_type=jnp.float32)
            outs.append(agg / l)
        if layer["concat"]:
            y = jnp.concatenate(outs, axis=-1) + layer["b"]
        else:
            y = sum(outs) / heads + layer["b"]
        if is_last:
            z = y
        else:
            y = jnp.where(y > 0, y, jnp.expm1(jnp.minimum(y, 0.0)))
            h = y.astype(jnp.bfloat16)
    y = z
    for W, b, act in zip(params["dec_w"], params["dec_b"], params["dec_acts"]):
        y = jnp.dot(y.astype(jnp.bfloat16), W, preferred_element_type=jnp.float32) + b
        if act == "elu":
            y = jnp.where(y > 0, y, jnp.expm1(jnp.minimum(y, 0.0)))
    return y, z


def _assert_close(a, b, name, tol=5e-2):
    a = jnp.asarray(a, jnp.float32)
    b = jnp.asarray(b, jnp.float32)
    denom = float(jnp.maximum(jnp.max(jnp.abs(b)), 1e-3))
    err = float(jnp.max(jnp.abs(a - b))) / denom
    assert err < tol, f"{name}: relative max error {err:.4f} >= {tol}"


# ----------------------------------------------------------------------------
# Demo
# ----------------------------------------------------------------------------

if __name__ == "__main__":
    N = 256               # number of cells (graph nodes)
    INPUT_DIM = 256       # genes
    HIDDEN_DIMS = [128, 128]
    LATENT_DIM = 64
    HEADS = 4

    key = jax.random.PRNGKey(0)
    key, kx = jax.random.split(key)
    x = jax.random.normal(kx, (N, INPUT_DIM), jnp.float32)

    # Two disconnected rings (0..127 and 128..255): with 128x128 tiles the
    # off-diagonal adjacency tiles are empty, exercising the block-sparse skip.
    half = N // 2
    i0 = jnp.arange(half)
    src = jnp.concatenate([i0, i0, i0 + half, i0 + half])
    tgt = jnp.concatenate([(i0 + 1) % half, (i0 - 1) % half,
                           (i0 + 1) % half + half, (i0 - 1) % half + half])
    edge_index = jnp.stack([src, tgt], axis=0)
    mask = build_dense_mask(edge_index, N)

    params = init_scgac_params(key, INPUT_DIM, HIDDEN_DIMS, LATENT_DIM, heads=HEADS)
    exp_dtype = _default_exp_dtype()

    # Small tiles here so the demo exercises multi-tile online softmax + skipping.
    x_recon, z = scgac_forward(params, x, mask, tq=128, tk=128, exp_dtype=exp_dtype)
    jax.block_until_ready((x_recon, z))

    assert x_recon.shape == (N, INPUT_DIM), x_recon.shape
    assert z.shape == (N, LATENT_DIM), z.shape
    assert bool(jnp.all(jnp.isfinite(x_recon))) and bool(jnp.all(jnp.isfinite(z)))

    # Correctness vs pure-JAX reference with the same dtype handling.
    x_ref, z_ref = ref_forward(params, x, mask, exp_dtype=exp_dtype)
    _assert_close(z, z_ref, "latent")
    _assert_close(x_recon, x_ref, "recon")

    print("KERNEL_OK")
</pallas_src>

<mosaic_0001>
module attributes {stable_mosaic.version = 11 : i64} {
  func.func @_matmul_kernel(%arg0: i32, %arg1: i32, %arg2: i32, %arg3: memref<256x256xbf16, #tpu.memory_space<vmem>>, %arg4: memref<256x128xbf16, #tpu.memory_space<vmem>>, %arg5: memref<256x128xbf16, #tpu.memory_space<vmem>>, %arg6: memref<256x128xf32, #tpu.memory_space<vmem>>) attributes {dimension_semantics = [#tpu.dimension_semantics<parallel>, #tpu.dimension_semantics<parallel>, #tpu.dimension_semantics<arbitrary>], iteration_bounds = array<i64: 1, 1, 1>, scalar_prefetch = 0 : i64, scratch_operands = 1 : i64, tpu.core_type = #tpu.core_type<tc>, window_params = [{transform_indices = @transform_0, window_bounds = array<i64: 256, 256>}, {transform_indices = @transform_1, window_bounds = array<i64: 256, 128>}, {transform_indices = @transform_2, window_bounds = array<i64: 256, 128>}]} {
    %c0_i32 = arith.constant 0 : i32
    %0 = arith.cmpi eq, %arg2, %c0_i32 : i32
    %1 = arith.extui %0 : i1 to i32
    %c0_i32_0 = arith.constant 0 : i32
    %2 = arith.cmpi ne, %1, %c0_i32_0 : i32
    scf.if %2 {
      %cst_10 = arith.constant 0.000000e+00 : f32
      %12 = vector.broadcast %cst_10 : f32 to vector<256x128xf32>
      %c0_11 = arith.constant 0 : index
      %c0_12 = arith.constant 0 : index
      %13 = vector.load %arg6[%c0_11, %c0_12] : memref<256x128xf32, #tpu.memory_space<vmem>>, vector<256x128xf32>
      tpu.vector_store %arg6[%c0_11, %c0_12], %12 {strides = array<i32>} : memref<256x128xf32, #tpu.memory_space<vmem>>, vector<256x128xf32>,
    } else {
    }
    %c0 = arith.constant 0 : index
    %c0_1 = arith.constant 0 : index
    %3 = vector.load %arg6[%c0, %c0_1] : memref<256x128xf32, #tpu.memory_space<vmem>>, vector<256x128xf32>
    %c0_2 = arith.constant 0 : index
    %c0_3 = arith.constant 0 : index
    %4 = vector.load %arg3[%c0_2, %c0_3] : memref<256x256xbf16, #tpu.memory_space<vmem>>, vector<256x256xbf16>
    %c0_4 = arith.constant 0 : index
    %c0_5 = arith.constant 0 : index
    %5 = vector.load %arg4[%c0_4, %c0_5] : memref<256x128xbf16, #tpu.memory_space<vmem>>, vector<256x128xbf16>
    %cst = arith.constant dense<0.000000e+00> : vector<256x128xf32>
    %6 = tpu.matmul %4, %5, %cst {dimension_numbers = #tpu.dot_dimension_numbers<[1], [0], [0], [1], [0, 0, 1, 1], [], []>} : vector<256x256xbf16>, vector<256x128xbf16>, vector<256x128xf32> -> vector<256x128xf32>
    %7 = arith.addf %3, %6 : vector<256x128xf32>
    %c0_6 = arith.constant 0 : index
    %c0_7 = arith.constant 0 : index
    %8 = vector.load %arg6[%c0_6, %c0_7] : memref<256x128xf32, #tpu.memory_space<vmem>>, vector<256x128xf32>
    tpu.vector_store %arg6[%c0_6, %c0_7], %7 {strides = array<i32>} : memref<256x128xf32, #tpu.memory_space<vmem>>, vector<256x128xf32>,
    %c0_i32_8 = arith.constant 0 : i32
    %9 = arith.cmpi eq, %arg2, %c0_i32_8 : i32
    %10 = arith.extui %9 : i1 to i32
    %c0_i32_9 = arith.constant 0 : i32
    %11 = arith.cmpi ne, %10, %c0_i32_9 : i32
    scf.if %11 {
      %c0_10 = arith.constant 0 : index
      %c0_11 = arith.constant 0 : index
      %12 = vector.load %arg6[%c0_10, %c0_11] : memref<256x128xf32, #tpu.memory_space<vmem>>, vector<256x128xf32>
      %13 = arith.truncf %12 : vector<256x128xf32> to vector<256x128xbf16>
      %c0_12 = arith.constant 0 : index
      %c0_13 = arith.constant 0 : index
      %14 = vector.load %arg5[%c0_12, %c0_13] : memref<256x128xbf16, #tpu.memory_space<vmem>>, vector<256x128xbf16>
      tpu.vector_store %arg5[%c0_12, %c0_13], %13 {strides = array<i32>} : memref<256x128xbf16, #tpu.memory_space<vmem>>, vector<256x128xbf16>,
    } else {
    }
    return
  }
  func.func @transform_0(%arg0: i32, %arg1: i32, %arg2: i32) -> (i32, i32) {
    %c0_i32 = arith.constant 0 : i32
    return %arg0, %arg2 : i32, i32
  }
  func.func @transform_1(%arg0: i32, %arg1: i32, %arg2: i32) -> (i32, i32) {
    %c0_i32 = arith.constant 0 : i32
    return %arg2, %arg1 : i32, i32
  }
  func.func @transform_2(%arg0: i32, %arg1: i32, %arg2: i32) -> (i32, i32) {
    %c0_i32 = arith.constant 0 : i32
    return %arg0, %arg1 : i32, i32
  }
}

</mosaic_0001>

<bundles_post_ra>
// kernel: tpu_custom_call.1
= control target key start
LH: loop header
LB: loop body
LE: loop exit
PB: predicated region body
PF: predicated region fallthrough
CT: control target
= control target key end

     0   :  { %7 = vsyncpa [#allocation4], 0  ;;  %s1409_s0 = inlined_call_operand.hbm [shape: bf16[256,256], index: 0, kind: input, shape index: {}]   ;;  %s1410_s1 = inlined_call_operand.hbm [shape: bf16[256,128], index: 1, kind: input, shape index: {}]   ;;  %s1411_s2 = inlined_call_operand.hbm [shape: bf16[256,128], index: 2, kind: output, shape index: {}]  }
   0x1   :  { %8 = vsyncpa [#allocation7], 0 }
   0x2   :  { %9 = vsyncpa [#allocation5], 0  ;;  %s1345_s9 = smov [#allocation3]   ;;  %s1273_s13 = scalar_lea.hbm %s1409_s0, 4096 }
   0x3   :  { %s15_s10 = sshll.u32 %s1345_s9, 4  ;;  %p1274_p0 = scmp.ne.s32.totalorder %s1409_s0, %s1273_s13  ;;  %s16_s10 = int_to_ptr.vmem [resolvable:$true] %s15_s10 }
   0x4   :  { %p1277_p1 = scmp.lt.u32.totalorder %s1273_s13, %s1409_s0 }
   0x6   :  { %p1279_p2 = pnand %p1277_p1, %p1274_p0 }
   0x8   :  { %1282 = shalt.err (!%p1279_p2)
}
   0x9   :  { %s1283_s18 = scalar_lea.vmem %s16_s10, 4096  ;;  %p1288_p4 = scmp.lt.s32.totalorder %s16_s10, %s16_s10 }
   0xa   :  { %p1284_p3 = scmp.ne.s32.totalorder %s16_s10, %s1283_s18  ;;  %p1289_p5 = scmp.lt.s32.totalorder %s1283_s18, %s1283_s18 }
   0xc   :  { %p1290_p6 = por %p1289_p5, %p1288_p4 }
   0xe   :  { %p1291_p7 = pnand %p1290_p6, %p1284_p3 }
  0x10   :  { %1294 = shalt.err (!%p1291_p7)
}
  0x11   :  { %s1346_s19 = smov 128   ;;  %s1347_s20 = smov 8  }
  0x12   :  { %21 = dma.hbm_to_vmem [thread:$0]  %s1409_s0, 4096, %s16_s10, [#allocation4], %s1346_s19, %s1346_s19, %s1347_s20  }
  0x13   :  { %s1348_s23 = smov [#allocation6]   ;;  %s1295_s27 = scalar_lea.hbm %s1410_s1, 2048 }
  0x14   :  { %s27_s24 = sshll.u32 %s1348_s23, 4  ;;  %p1296_p8 = scmp.ne.s32.totalorder %s1410_s1, %s1295_s27  ;;  %s28_s24 = int_to_ptr.vmem [resolvable:$true] %s27_s24 }
  0x15   :  { %p1299_p9 = scmp.lt.u32.totalorder %s1295_s27, %s1410_s1 }
  0x17   :  { %p1301_p10 = pnand %p1299_p9, %p1296_p8 }
  0x19   :  { %1304 = shalt.err (!%p1301_p10)
}
  0x1a   :  { %s1305_s4 = scalar_lea.vmem %s28_s24, 2048  ;;  %p1310_p12 = scmp.lt.s32.totalorder %s28_s24, %s28_s24 }
  0x1b   :  { %p1306_p11 = scmp.ne.s32.totalorder %s28_s24, %s1305_s4  ;;  %p1311_p13 = scmp.lt.s32.totalorder %s1305_s4, %s1305_s4 }
  0x1d   :  { %p1312_p0 = por %p1311_p13, %p1310_p12 }
  0x1f   :  { %p1313_p1 = pnand %p1312_p0, %p1306_p11 }
  0x21   :  { %1316 = shalt.err (!%p1313_p1)
}
  0x22   :  { %s1349_s0 = smov 64   ;;  %s1350_s5 = smov 4  }
  0x23   :  { %33 = dma.hbm_to_vmem [thread:$0]  %s1410_s1, 2048, %s28_s24, [#allocation7], %s1349_s0, %s1349_s0, %s1350_s5  }
  0x24   :  { %1339 = dma.done.wait [#allocation4], 4096  }
  0x25   :  { %1340 = vsyncadd [#allocation4], 4294963200 }
  0x26   :  { %1341 = dma.done.wait [#allocation7], 2048  }
  0x27   :  { %1342 = vsyncadd [#allocation7], 4294965248  ;;  %v1209_v0 = vld [vmem:[#allocation6 + $0x40] sm:$0xff]   ;;  %v1211_v2 = vld [vmem:[#allocation6 + $0x48] sm:$0xff]   ;;  %s1351_s1 = smov [#allocation8]  }
  0x28   :  { %v1210_v1 = vld [vmem:[#allocation6] sm:$0xff]   ;;  %1074 = vmatprep.subr.bf16.mxu0 %v1209_v0  ;;  %1186 = vmatprep.subr.bf16.mxu1 %v1209_v0  ;;  %v1212_v3 = vld [vmem:[#allocation6 + $0x8] sm:$0xff]   ;;  %v1213_v4 = vld [vmem:[#allocation6 + $0x50] sm:$0xff]   ;;  %s854_s8 = sshll.u32 %s1351_s1, 4  ;;  %s855_s8 = int_to_ptr.vmem [resolvable:$true] %s854_s8 }
  0x29   :  { %1075 = vmatpush3.bf16.msra.mxu0 %v1210_v1  ;;  %1194 = vmatpush3.bf16.msra.mxu1 %v1210_v1  ;;  %v1214_v5 = vld [vmem:[#allocation6 + $0x10] sm:$0xff]   ;;  %v1215_v6 = vld [vmem:[#allocation6 + $0x58] sm:$0xff]   ;;  %v1217_v8 = vld [vmem:[#allocation6 + $0x60] sm:$0xff]   ;;  %s1317_s9 = scalar_lea.vmem %s855_s8, 2048  ;;  %p1322_p3 = scmp.lt.s32.totalorder %s855_s8, %s855_s8 }
  0x2a   :  { %1076 = vmatprep.subr.bf16.mxu0 %v1211_v2  ;;  %1187 = vmatprep.subr.bf16.mxu1 %v1211_v2  ;;  %v1216_v7 = vld [vmem:[#allocation6 + $0x18] sm:$0xff]   ;;  %v1218_v9 = vld [vmem:[#allocation6 + $0x20] sm:$0xff]   ;;  %v1219_v10 = vld [vmem:[#allocation6 + $0x68] sm:$0xff]   ;;  %p1318_p2 = scmp.ne.s32.totalorder %s855_s8, %s1317_s9  ;;  %p1323_p4 = scmp.lt.s32.totalorder %s1317_s9, %s1317_s9 }
  0x2b   :  { %v1227_v11 = vld [vmem:[#allocation3 + $0x4] ss:$8 sps:$4 sm:$0xff]   ;;  %v1221_v14 = vld [vmem:[#allocation6 + $0x70] sm:$0xff]   ;;  %v1223_v16 = vld [vmem:[#allocation6 + $0x78] sm:$0xff]  }
  0x2c   :  { %v1230_v12 = vld [vmem:[#allocation3 + $0x84] ss:$8 sps:$4 sm:$0xff]   ;;  %461 = vmatprep.mubr.bf16.mxu0 %v1227_v11  ;;  %v1222_v15 = vld [vmem:[#allocation6 + $0x30] sm:$0xff]   ;;  %v1224_v17 = vld [vmem:[#allocation6 + $0x38] sm:$0xff]   ;;  %p1324_p5 = por %p1323_p4, %p1322_p3 }
  0x2d   :  { %1077 = vmatpush3.bf16.msra.mxu0 %v1212_v3  ;;  %1195 = vmatpush3.bf16.msra.mxu1 %v1212_v3  ;;  %v1220_v13 = vld [vmem:[#allocation6 + $0x28] sm:$0xff]   ;;  %v1231_v20 = vld [vmem:[#allocation3 + $0x14] ss:$8 sps:$4 sm:$0xff]   ;;  %v1235_v22 = vld [vmem:[#allocation3 + $0x10] ss:$8 sps:$4 sm:$0xff]  }
  0x2e   :  { %1078 = vmatprep.subr.bf16.mxu0 %v1213_v4  ;;  %1188 = vmatprep.subr.bf16.mxu1 %v1213_v4  ;;  %v1225_v18 = vld [vmem:[#allocation3] ss:$8 sps:$4 sm:$0xff]   ;;  %v1233_v21 = vld [vmem:[#allocation3 + $0x94] ss:$8 sps:$4 sm:$0xff]   ;;  %v1236_v23 = vld [vmem:[#allocation3 + $0x90] ss:$8 sps:$4 sm:$0xff]   ;;  %p1325_p6 = pnand %p1324_p5, %p1318_p2 }
  0x2f   :  { %525 = vmatprep.mubr.bf16.mxu1 %v1230_v12  ;;  %v1228_v19 = vld [vmem:[#allocation3 + $0x80] ss:$8 sps:$4 sm:$0xff]   ;;  %v1237_v24 = vld [vmem:[#allocation3 + $0x24] ss:$8 sps:$4 sm:$0xff]   ;;  %v1243_v28 = vld [vmem:[#allocation3 + $0x34] ss:$8 sps:$4 sm:$0xff]  }
  0x30   :  { %v1239_v25 = vld [vmem:[#allocation3 + $0xa4] ss:$8 sps:$4 sm:$0xff]   ;;  %v1241_v26 = vld [vmem:[#allocation3 + $0x20] ss:$8 sps:$4 sm:$0xff]   ;;  %v1245_v29 = vld [vmem:[#allocation3 + $0xb4] ss:$8 sps:$4 sm:$0xff]  }
  0x31   :  { %1079 = vmatpush3.bf16.msra.mxu0 %v1214_v5  ;;  %1196 = vmatpush3.bf16.msra.mxu1 %v1214_v5  ;;  %v1242_v27 = vld [vmem:[#allocation3 + $0xa0] ss:$8 sps:$4 sm:$0xff]   ;;  %v1247_v30 = vld [vmem:[#allocation3 + $0x30] ss:$8 sps:$4 sm:$0xff]   ;;  %v1249_v32 = vld [vmem:[#allocation3 + $0x44] ss:$8 sps:$4 sm:$0xff]  }
  0x32   :  { %1080 = vmatprep.subr.bf16.mxu0 %v1215_v6  ;;  %1189 = vmatprep.subr.bf16.mxu1 %v1215_v6  ;;  %v1248_v31 = vld [vmem:[#allocation3 + $0xb0] ss:$8 sps:$4 sm:$0xff]   ;;  %v1251_v33 = vld [vmem:[#allocation3 + $0xc4] ss:$8 sps:$4 sm:$0xff]   ;;  %v1253_v34 = vld [vmem:[#allocation3 + $0x40] ss:$8 sps:$4 sm:$0xff]  }
  0x33   :  { %v1254_v35 = vld [vmem:[#allocation3 + $0xc0] ss:$8 sps:$4 sm:$0xff]   ;;  %v1255_v36 = vld [vmem:[#allocation3 + $0x54] ss:$8 sps:$4 sm:$0xff]   ;;  %v1259_v38 = vld [vmem:[#allocation3 + $0x50] ss:$8 sps:$4 sm:$0xff]  }
  0x34   :  { %v1257_v37 = vld [vmem:[#allocation3 + $0xd4] ss:$8 sps:$4 sm:$0xff]   ;;  %v1260_v39 = vld [vmem:[#allocation3 + $0xd0] ss:$8 sps:$4 sm:$0xff]   ;;  %v1261_v40 = vld [vmem:[#allocation3 + $0x64] ss:$8 sps:$4 sm:$0xff]  }
  0x35   :  { %1081 = vmatpush3.bf16.msra.mxu0 %v1216_v7  ;;  %1197 = vmatpush3.bf16.msra.mxu1 %v1216_v7  ;;  %v1263_v41 = vld [vmem:[#allocation3 + $0xe4] ss:$8 sps:$4 sm:$0xff]   ;;  %v1265_v42 = vld [vmem:[#allocation3 + $0x60] ss:$8 sps:$4 sm:$0xff]   ;;  %v1267_v44 = vld [vmem:[#allocation3 + $0x74] ss:$8 sps:$4 sm:$0xff]  }
  0x36   :  { %1082 = vmatprep.subr.bf16.mxu0 %v1217_v8  ;;  %1190 = vmatprep.subr.bf16.mxu1 %v1217_v8  ;;  %v1266_v43 = vld [vmem:[#allocation3 + $0xe0] ss:$8 sps:$4 sm:$0xff]   ;;  %v1269_v45 = vld [vmem:[#allocation3 + $0xf4] ss:$8 sps:$4 sm:$0xff]   ;;  %v1271_v46 = vld [vmem:[#allocation3 + $0x70] ss:$8 sps:$4 sm:$0xff]  }
  0x37   :  { %v1272_v47 = vld [vmem:[#allocation3 + $0xf0] ss:$8 sps:$4 sm:$0xff]  }
  0x39   :  { %1083 = vmatpush3.bf16.msra.mxu0 %v1218_v9  ;;  %1198 = vmatpush3.bf16.msra.mxu1 %v1218_v9 }
  0x3a   :  { %1084 = vmatprep.subr.bf16.mxu0 %v1219_v10  ;;  %1191 = vmatprep.subr.bf16.mxu1 %v1219_v10 }
  0x3d   :  { %1085 = vmatpush3.bf16.msra.mxu0 %v1220_v13  ;;  %1199 = vmatpush3.bf16.msra.mxu1 %v1220_v13 }
  0x3e   :  { %1086 = vmatprep.subr.bf16.mxu0 %v1221_v14  ;;  %1192 = vmatprep.subr.bf16.mxu1 %v1221_v14 }
  0x41   :  { %1087 = vmatpush3.bf16.msra.mxu0 %v1222_v15  ;;  %1200 = vmatpush3.bf16.msra.mxu1 %v1222_v15 }
  0x42   :  { %1088 = vmatprep.subr.bf16.mxu0 %v1223_v16  ;;  %1193 = vmatprep.subr.bf16.mxu1 %v1223_v16 }
  0x45   :  { %1089 = vmatpush3.bf16.msra.mxu0 %v1224_v17  ;;  %1201 = vmatpush3.bf16.msra.mxu1 %v1224_v17 }
  0x48   :  { %462 = vmatmul.mubr.bf16.vlgmr.msra.gmra.mrb[0].mxu0 %v1225_v18  ;;  %526 = vmatmul.mubr.bf16.vlgmr.msra.gmra.mrb[0].mxu1 %v1228_v19 }
  0x49   :  { %469 = vmatprep.mubr.bf16.mxu0 %v1231_v20  ;;  %533 = vmatprep.mubr.bf16.mxu1 %v1233_v21 }
  0x50   :  { %470 = vmatmul.mubr.bf16.gmra.mrb[4].mxu0 %v1235_v22  ;;  %534 = vmatmul.mubr.bf16.gmra.mrb[4].mxu1 %v1236_v23 }
  0x51   :  { %477 = vmatprep.mubr.bf16.mxu0 %v1237_v24  ;;  %541 = vmatprep.mubr.bf16.mxu1 %v1239_v25 }
  0x58   :  { %478 = vmatmul.mubr.bf16.gmra.mrb[8].mxu0 %v1241_v26  ;;  %542 = vmatmul.mubr.bf16.gmra.mrb[8].mxu1 %v1242_v27 }
  0x59   :  { %485 = vmatprep.mubr.bf16.mxu0 %v1243_v28  ;;  %549 = vmatprep.mubr.bf16.mxu1 %v1245_v29 }
  0x60   :  { %486 = vmatmul.mubr.bf16.gmra.mrb[12].mxu0 %v1247_v30  ;;  %550 = vmatmul.mubr.bf16.gmra.mrb[12].mxu1 %v1248_v31 }
  0x61   :  { %493 = vmatprep.mubr.bf16.mxu0 %v1249_v32  ;;  %557 = vmatprep.mubr.bf16.mxu1 %v1251_v33 }
  0x68   :  { %494 = vmatmul.mubr.bf16.gmra.mrb[16].mxu0 %v1253_v34  ;;  %558 = vmatmul.mubr.bf16.gmra.mrb[16].mxu1 %v1254_v35 }
  0x69   :  { %501 = vmatprep.mubr.bf16.mxu0 %v1255_v36  ;;  %565 = vmatprep.mubr.bf16.mxu1 %v1257_v37 }
  0x70   :  { %502 = vmatmul.mubr.bf16.gmra.mrb[20].mxu0 %v1259_v38  ;;  %566 = vmatmul.mubr.bf16.gmra.mrb[20].mxu1 %v1260_v39 }
  0x71   :  { %509 = vmatprep.mubr.bf16.mxu0 %v1261_v40  ;;  %573 = vmatprep.mubr.bf16.mxu1 %v1263_v41 }
  0x78   :  { %510 = vmatmul.mubr.bf16.gmra.mrb[24].mxu0 %v1265_v42  ;;  %574 = vmatmul.mubr.bf16.gmra.mrb[24].mxu1 %v1266_v43 }
  0x79   :  { %517 = vmatprep.mubr.bf16.mxu0 %v1267_v44  ;;  %581 = vmatprep.mubr.bf16.mxu1 %v1269_v45 }
  0x80   :  { %518 = vmatmul.mubr.bf16.gmra.mrb[28].mxu0 %v1271_v46  ;;  %582 = vmatmul.mubr.bf16.gmra.mrb[28].mxu1 %v1272_v47 }
 0x11b   :  { %v1090_v48 = vpop.f32.mrb[0].mxu0  ;;  %v1138_v49 = vpop.f32.mrb[0].mxu1 }
 0x11c   :  { %v1091_v50 = vpop.f32.mrb[1].mxu0  ;;  %v1139_v51 = vpop.f32.mrb[1].mxu1 }
 0x11d   :  { %v1092_v52 = vadd.f32 %v1091_v50, %v1090_v48  ;;  %v1140_v53 = vadd.f32 %v1139_v51, %v1138_v49  ;;  %v1093_v54 = vpop.f32.mrb[2].mxu0  ;;  %v1141_v55 = vpop.f32.mrb[2].mxu1 }
 0x11e   :  { %v1094_v56 = vpop.f32.mrb[3].mxu0  ;;  %v1142_v57 = vpop.f32.mrb[3].mxu1 }
 0x11f   :  { %v1095_v58 = vadd.f32 %v1094_v56, %v1093_v54  ;;  %v1143_v59 = vadd.f32 %v1142_v57, %v1141_v55 }
 0x121   :  { %v982_v60 = vpack.c.bf16 %v1095_v58, %v1092_v52  ;;  %v1022_v61 = vpack.c.bf16 %v1143_v59, %v1140_v53 }
 0x123   :  { %983 = vst [vmem:[#allocation8] sm:$0xff] %v982_v60   ;;  %1066 = vst [vmem:[#allocation8 + $0x40] sm:$0xff] %v1022_v61   ;;  %v1096_v62 = vpop.f32.mrb[4].mxu0  ;;  %v1144_v63 = vpop.f32.mrb[4].mxu1 }
 0x124   :  { %v1097_v0 = vpop.f32.mrb[5].mxu0  ;;  %v1145_v1 = vpop.f32.mrb[5].mxu1 }
 0x125   :  { %v1098_v2 = vadd.f32 %v1097_v0, %v1096_v62  ;;  %v1146_v3 = vadd.f32 %v1145_v1, %v1144_v63  ;;  %v1099_v4 = vpop.f32.mrb[6].mxu0  ;;  %v1147_v5 = vpop.f32.mrb[6].mxu1 }
 0x126   :  { %v1100_v6 = vpop.f32.mrb[7].mxu0  ;;  %v1148_v7 = vpop.f32.mrb[7].mxu1 }
 0x127   :  { %v1101_v8 = vadd.f32 %v1100_v6, %v1099_v4  ;;  %v1149_v9 = vadd.f32 %v1148_v7, %v1147_v5 }
 0x129   :  { %v987_v10 = vpack.c.bf16 %v1101_v8, %v1098_v2  ;;  %v1027_v11 = vpack.c.bf16 %v1149_v9, %v1146_v3 }
 0x12b   :  { %1059 = vst [vmem:[#allocation8 + $0x8] sm:$0xff] %v987_v10   ;;  %1067 = vst [vmem:[#allocation8 + $0x48] sm:$0xff] %v1027_v11   ;;  %v1102_v12 = vpop.f32.mrb[8].mxu0  ;;  %v1150_v13 = vpop.f32.mrb[8].mxu1 }
 0x12c   :  { %v1103_v14 = vpop.f32.mrb[9].mxu0  ;;  %v1151_v15 = vpop.f32.mrb[9].mxu1 }
 0x12d   :  { %v1104_v16 = vadd.f32 %v1103_v14, %v1102_v12  ;;  %v1152_v17 = vadd.f32 %v1151_v15, %v1150_v13  ;;  %v1105_v18 = vpop.f32.mrb[10].mxu0  ;;  %v1153_v19 = vpop.f32.mrb[10].mxu1 }
 0x12e   :  { %v1106_v20 = vpop.f32.mrb[11].mxu0  ;;  %v1154_v21 = vpop.f32.mrb[11].mxu1 }
 0x12f   :  { %v1107_v22 = vadd.f32 %v1106_v20, %v1105_v18  ;;  %v1155_v23 = vadd.f32 %v1154_v21, %v1153_v19 }
 0x131   :  { %v992_v24 = vpack.c.bf16 %v1107_v22, %v1104_v16  ;;  %v1032_v25 = vpack.c.bf16 %v1155_v23, %v1152_v17 }
 0x133   :  { %1060 = vst [vmem:[#allocation8 + $0x10] sm:$0xff] %v992_v24   ;;  %1068 = vst [vmem:[#allocation8 + $0x50] sm:$0xff] %v1032_v25   ;;  %v1108_v26 = vpop.f32.mrb[12].mxu0  ;;  %v1156_v27 = vpop.f32.mrb[12].mxu1 }
 0x134   :  { %v1109_v28 = vpop.f32.mrb[13].mxu0  ;;  %v1157_v29 = vpop.f32.mrb[13].mxu1 }
 0x135   :  { %v1110_v30 = vadd.f32 %v1109_v28, %v1108_v26  ;;  %v1158_v31 = vadd.f32 %v1157_v29, %v1156_v27  ;;  %v1111_v32 = vpop.f32.mrb[14].mxu0  ;;  %v1159_v33 = vpop.f32.mrb[14].mxu1 }
 0x136   :  { %v1112_v34 = vpop.f32.mrb[15].mxu0  ;;  %v1160_v35 = vpop.f32.mrb[15].mxu1 }
 0x137   :  { %v1113_v36 = vadd.f32 %v1112_v34, %v1111_v32  ;;  %v1161_v37 = vadd.f32 %v1160_v35, %v1159_v33 }
 0x139   :  { %v997_v38 = vpack.c.bf16 %v1113_v36, %v1110_v30  ;;  %v1037_v39 = vpack.c.bf16 %v1161_v37, %v1158_v31 }
 0x13b   :  { %1061 = vst [vmem:[#allocation8 + $0x18] sm:$0xff] %v997_v38   ;;  %1069 = vst [vmem:[#allocation8 + $0x58] sm:$0xff] %v1037_v39   ;;  %v1114_v40 = vpop.f32.mrb[16].mxu0  ;;  %v1162_v41 = vpop.f32.mrb[16].mxu1 }
 0x13c   :  { %v1115_v42 = vpop.f32.mrb[17].mxu0  ;;  %v1163_v43 = vpop.f32.mrb[17].mxu1 }
 0x13d   :  { %v1116_v44 = vadd.f32 %v1115_v42, %v1114_v40  ;;  %v1164_v45 = vadd.f32 %v1163_v43, %v1162_v41  ;;  %v1117_v46 = vpop.f32.mrb[18].mxu0  ;;  %v1165_v47 = vpop.f32.mrb[18].mxu1 }
 0x13e   :  { %v1118_v48 = vpop.f32.mrb[19].mxu0  ;;  %v1166_v49 = vpop.f32.mrb[19].mxu1 }
 0x13f   :  { %v1119_v50 = vadd.f32 %v1118_v48, %v1117_v46  ;;  %v1167_v51 = vadd.f32 %v1166_v49, %v1165_v47 }
 0x141   :  { %v1002_v52 = vpack.c.bf16 %v1119_v50, %v1116_v44  ;;  %v1042_v53 = vpack.c.bf16 %v1167_v51, %v1164_v45 }
 0x143   :  { %1062 = vst [vmem:[#allocation8 + $0x20] sm:$0xff] %v1002_v52   ;;  %1070 = vst [vmem:[#allocation8 + $0x60] sm:$0xff] %v1042_v53   ;;  %v1120_v54 = vpop.f32.mrb[20].mxu0  ;;  %v1168_v55 = vpop.f32.mrb[20].mxu1 }
 0x144   :  { %v1121_v56 = vpop.f32.mrb[21].mxu0  ;;  %v1169_v57 = vpop.f32.mrb[21].mxu1 }
 0x145   :  { %v1122_v58 = vadd.f32 %v1121_v56, %v1120_v54  ;;  %v1170_v59 = vadd.f32 %v1169_v57, %v1168_v55  ;;  %v1123_v60 = vpop.f32.mrb[22].mxu0  ;;  %v1171_v61 = vpop.f32.mrb[22].mxu1 }
 0x146   :  { %v1124_v62 = vpop.f32.mrb[23].mxu0  ;;  %v1172_v63 = vpop.f32.mrb[23].mxu1 }
 0x147   :  { %v1125_v0 = vadd.f32 %v1124_v62, %v1123_v60  ;;  %v1173_v1 = vadd.f32 %v1172_v63, %v1171_v61 }
 0x149   :  { %v1007_v2 = vpack.c.bf16 %v1125_v0, %v1122_v58  ;;  %v1047_v3 = vpack.c.bf16 %v1173_v1, %v1170_v59 }
 0x14b   :  { %1063 = vst [vmem:[#allocation8 + $0x28] sm:$0xff] %v1007_v2   ;;  %1071 = vst [vmem:[#allocation8 + $0x68] sm:$0xff] %v1047_v3   ;;  %v1126_v4 = vpop.f32.mrb[24].mxu0  ;;  %v1174_v5 = vpop.f32.mrb[24].mxu1 }
 0x14c   :  { %v1127_v6 = vpop.f32.mrb[25].mxu0  ;;  %v1175_v7 = vpop.f32.mrb[25].mxu1 }
 0x14d   :  { %v1128_v8 = vadd.f32 %v1127_v6, %v1126_v4  ;;  %v1176_v9 = vadd.f32 %v1175_v7, %v1174_v5  ;;  %v1129_v10 = vpop.f32.mrb[26].mxu0  ;;  %v1177_v11 = vpop.f32.mrb[26].mxu1 }
 0x14e   :  { %v1130_v12 = vpop.f32.mrb[27].mxu0  ;;  %v1178_v13 = vpop.f32.mrb[27].mxu1 }
 0x14f   :  { %v1131_v14 = vadd.f32 %v1130_v12, %v1129_v10  ;;  %v1179_v15 = vadd.f32 %v1178_v13, %v1177_v11 }
 0x151   :  { %v1012_v16 = vpack.c.bf16 %v1131_v14, %v1128_v8  ;;  %v1052_v17 = vpack.c.bf16 %v1179_v15, %v1176_v9 }
 0x153   :  { %1064 = vst [vmem:[#allocation8 + $0x30] sm:$0xff] %v1012_v16   ;;  %1072 = vst [vmem:[#allocation8 + $0x70] sm:$0xff] %v1052_v17   ;;  %v1132_v18 = vpop.f32.mrb[28].mxu0  ;;  %v1180_v19 = vpop.f32.mrb[28].mxu1 }
 0x154   :  { %v1133_v20 = vpop.f32.mrb[29].mxu0  ;;  %v1181_v21 = vpop.f32.mrb[29].mxu1 }
 0x155   :  { %v1134_v22 = vadd.f32 %v1133_v20, %v1132_v18  ;;  %v1182_v23 = vadd.f32 %v1181_v21, %v1180_v19  ;;  %v1135_v24 = vpop.f32.mrb[30].mxu0  ;;  %v1183_v25 = vpop.f32.mrb[30].mxu1 }
 0x156   :  { %v1136_v26 = vpop.f32.mrb[31].mxu0  ;;  %v1184_v27 = vpop.f32.mrb[31].mxu1 }
 0x157   :  { %v1137_v28 = vadd.f32 %v1136_v26, %v1135_v24  ;;  %v1185_v29 = vadd.f32 %v1184_v27, %v1183_v25 }
 0x159   :  { %v1017_v30 = vpack.c.bf16 %v1137_v28, %v1134_v22  ;;  %v1057_v31 = vpack.c.bf16 %v1185_v29, %v1182_v23 }
 0x15b   :  { %1065 = vst [vmem:[#allocation8 + $0x38] sm:$0xff] %v1017_v30   ;;  %1073 = vst [vmem:[#allocation8 + $0x78] sm:$0xff] %v1057_v31  }
 0x15c   :  { %1328 = shalt.err (!%p1325_p6)
}
 0x15d   :  { %s1329_s12 = scalar_lea.hbm %s1411_s2, 2048 }
 0x15e   :  { %p1330_p7 = scmp.ne.s32.totalorder %s1411_s2, %s1329_s12  ;;  %p1333_p8 = scmp.lt.u32.totalorder %s1329_s12, %s1411_s2 }
 0x160   :  { %p1335_p9 = pnand %p1333_p8, %p1330_p7 }
 0x162   :  { %1338 = shalt.err (!%p1335_p9)
}
 0x163   :  { %860 = dma.vmem_to_hbm [thread:$0]  %s855_s8, 2048, %s1411_s2, [#allocation5], %s1349_s0, %s1349_s0, %s1350_s5  }
 0x164   :  { %1343 = dma.done.wait [#allocation5], 2048  }
 0x165   :  { %1344 = vsyncadd [#allocation5], 4294965248 }
 0x166   :  { %864 = vsyncpa [#allocation4], 1 }
 0x167   :  { %865 = vsyncpa [#allocation7], 1 }
 0x168   :  { %866 = vsyncpa [#allocation5], 1 }

</bundles_post_ra>
